<compile_context>
chip_gen: v6e
topology: v6e:2x2x1
jax: 0.10.0
libtpu: 0.0.40
codegen_flags: <defaults>
</compile_context>

<pallas_src>
import jax
import jax.numpy as jnp
from jax import lax
from jax.experimental import pallas as pl
from jax.experimental.pallas import tpu as pltpu


_LANE = 128
_REG_ACC_LIMIT_BYTES = 128 * 1024     # accumulator <= 32 f32 vregs -> keep in registers


def _round_up(x, m):
    return (x + m - 1) // m * m


def _vmem_capacity_bytes():
    """Per-core VMEM capacity; conservative (v7x) fallback if the query fails."""
    try:
        cap = int(pltpu.get_tpu_info().vmem_capacity_bytes)
        if cap > 0:
            return cap
    except Exception:
        pass
    return 64 * 1024 * 1024


def _choose_t_tile(B, T, H, Klane, N, budget_bytes):
    """Largest divisor of T whose tiles fit the VMEM budget, preferring grids
    with an even number (>=2) of programs so both v7x TensorCores get work."""
    in_bytes = 2 * (T + 2) * (H + 2) * Klane * 2      # resident bf16 input, double-buffered
    w_bytes = 2 * 9 * Klane * N * 2                   # bf16 banded weights, double-buffered

    def fits(tt):
        out_bytes = 2 * tt * H * N * 4                # f32 output tile, double-buffered
        acc_bytes = tt * H * N * 4                    # worst case: VMEM accumulator
        return in_bytes + w_bytes + out_bytes + acc_bytes <= budget_bytes

    divisors = sorted((d for d in range(1, T + 1) if T % d == 0), reverse=True)
    fitting = [d for d in divisors if fits(d)] or [1]
    for d in fitting:                                  # largest tile with even, >=2 programs
        progs = B * (T // d)
        if progs >= 2 and progs % 2 == 0:
            return d
    for d in fitting:                                  # else any multi-program tile
        if B * (T // d) >= 2:
            return d
    return fitting[0]


def _band_weights(w_oidhw, W, Klane, dtype):
    """Fold the kw (width) taps + Cin contraction into a banded matmul weight,
    with output columns pre-permuted to (c, rh, w_out, rw) order.

    Returns B of shape [3, 3, Klane, W*Cout] with
      B[kd, kh, w_in*Cin + ci, ((c*2+rh)*W + w_out)*2 + rw]
        = w[c*4 + rh*2 + rw, ci, kd, kh, w_in - w_out]   (zero outside the band,
          zero in the K rows padded from (W+2)*Cin up to Klane).
    """
    Cout, Cin = w_oidhw.shape[0], w_oidhw.shape[1]
    Cf = Cout // 4
    Wp = W + 2
    Kw = Wp * Cin
    w_t = jnp.transpose(w_oidhw, (2, 3, 4, 1, 0)).astype(jnp.float32)   # [kd,kh,kw,Cin,Cout]
    kw = jnp.arange(3)[:, None, None]
    w_in = jnp.arange(Wp)[None, :, None]
    w_out = jnp.arange(W)[None, None, :]
    sel = (w_in == w_out + kw).astype(jnp.float32)                      # [3, Wp, W]
    band = jnp.einsum('kab,dhkio->dhaibo', sel, w_t)                    # [3,3,Wp,Cin,W,Cout]
    # column permutation (w_out, c, rh, rw) -> (c, rh, w_out, rw)
    band = band.reshape(3, 3, Wp, Cin, W, Cf, 2, 2)
    band = jnp.transpose(band, (0, 1, 2, 3, 5, 6, 4, 7))                # [3,3,Wp,Cin,Cf,2,W,2]
    band = band.reshape(3, 3, Kw, W * Cout)
    band = jnp.pad(band, ((0, 0), (0, 0), (0, Klane - Kw), (0, 0)))
    return band.astype(dtype)


def upsample_forward(x_ncdhw, w_oidhw, t_tile=None):
    """Forward pass of Upsample. x: [B, n_feat, T, H, W] (NCDHW), weight:
    [2*n_feat, n_feat, 3, 3, 3]. Returns [B, n_feat//2, T, 2H, 2W] (NCDHW)."""
    B, Cin, T, H, W = x_ncdhw.shape
    Cout = w_oidhw.shape[0]
    assert w_oidhw.shape == (Cout, Cin, 3, 3, 3)
    assert Cout % 4 == 0, "pixel-shuffle needs out_channels divisible by 4"
    Cf = Cout // 4
    Wp = W + 2
    Kw = Wp * Cin
    Klane = max(_LANE, _round_up(Kw, _LANE))          # lane/K dim padded to 128-multiple
    N = W * Cout                                      # lane-dense output width
    compute_dtype = jnp.bfloat16

    cap = _vmem_capacity_bytes()
    vmem_limit = min(int(cap * 3 // 4), 112 * 1024 * 1024)
    budget = int(vmem_limit * 0.85)

    tt = t_tile if t_tile is not None else _choose_t_tile(B, T, H, Klane, N, budget)
    assert T % tt == 0, (T, tt)
    nT = T // tt
    M = tt * H

    # Wrapper glue (layout only): channels-last, zero-pad T/H/W by 1, flatten
    # (W+2, Cin) onto the lane dim, pad it to Klane, cast to bf16.
    x = jnp.transpose(x_ncdhw, (0, 2, 3, 4, 1))                         # [B,T,H,W,Cin]
    x = jnp.pad(x, ((0, 0), (1, 1), (1, 1), (1, 1), (0, 0)))            # [B,T+2,H+2,Wp,Cin]
    x = x.reshape(B, T + 2, H + 2, Kw)
    if Klane > Kw:
        x = jnp.pad(x, ((0, 0), (0, 0), (0, 0), (0, Klane - Kw)))
    x = x.astype(compute_dtype)

    band = _band_weights(w_oidhw, W, Klane, compute_dtype)              # [3,3,Klane,N]

    use_reg_acc = (M * N * 4) <= _REG_ACC_LIMIT_BYTES

    def kernel(x_ref, b_ref, o_ref, *scratch):
        # x_ref: [1, T+2, H+2, Klane]  bf16, resident across the T-tile grid axis
        # b_ref: [3, 3, Klane, N]      bf16 banded weights (constant block)
        # o_ref: [1, tt, H, N]         f32 lane-dense output tile
        t0 = pl.program_id(1) * tt
        if use_reg_acc:
            acc = jnp.zeros((M, N), jnp.float32)
            for kd in range(3):
                # one slab load per kd; the 3 kh windows are value slices of it
                slab = x_ref[0, pl.ds(t0 + kd, tt), :, :]               # [tt, H+2, Klane]
                for kh in range(3):
                    lhs = slab[:, kh:kh + H, :].reshape(M, Klane)
                    acc = acc + jnp.dot(lhs, b_ref[kd, kh],
                                        preferred_element_type=jnp.float32)
            o_ref[0] = acc.reshape(tt, H, N).astype(o_ref.dtype)
        else:
            acc_ref = scratch[0]
            first = True
            for kd in range(3):
                for kh in range(3):
                    lhs = x_ref[0, pl.ds(t0 + kd, tt), kh:kh + H, :].reshape(M, Klane)
                    contrib = jnp.dot(lhs, b_ref[kd, kh],
                                      preferred_element_type=jnp.float32)
                    if first:
                        acc_ref[...] = contrib
                        first = False
                    else:
                        acc_ref[...] += contrib
            o_ref[0] = acc_ref[...].reshape(tt, H, N).astype(o_ref.dtype)

    scratch_shapes = [] if use_reg_acc else [pltpu.VMEM((M, N), jnp.float32)]

    y = pl.pallas_call(
        kernel,
        out_shape=jax.ShapeDtypeStruct((B, T, H, N), jnp.float32),
        grid_spec=pltpu.PrefetchScalarGridSpec(
            num_scalar_prefetch=0,
            grid=(B, nT),
            in_specs=[
                # full padded T slab per batch; constant along the T-tile axis,
                # so it is DMA'd only once per batch (no halo duplication).
                pl.BlockSpec((1, T + 2, H + 2, Klane), lambda b, t: (b, 0, 0, 0)),
                pl.BlockSpec((3, 3, Klane, N), lambda b, t: (0, 0, 0, 0)),
            ],
            out_specs=pl.BlockSpec((1, tt, H, N), lambda b, t: (b, t, 0, 0)),
            scratch_shapes=scratch_shapes,
        ),
        compiler_params=pltpu.CompilerParams(
            dimension_semantics=("parallel", "parallel"),
            vmem_limit_bytes=vmem_limit),
    )(x, band)

    # Pixel-shuffle: kernel lanes are already ordered (c, rh, w, rw), so this
    # is a reshape + one small-axis transpose with contiguous (rh, W, rw) chunks.
    y = y.reshape(B, T, H, Cf, 2, W, 2)
    return jnp.transpose(y, (0, 3, 1, 2, 4, 5, 6)).reshape(B, Cf, T, 2 * H, 2 * W)


def upsample_reference(x_ncdhw, w_oidhw):
    """Pure-JAX reference (lax conv + rearrange) for correctness checking."""
    dn = lax.conv_dimension_numbers(x_ncdhw.shape, w_oidhw.shape,
                                    ('NCDHW', 'OIDHW', 'NCDHW'))
    y = lax.conv_general_dilated(x_ncdhw, w_oidhw, (1, 1, 1),
                                 [(1, 1), (1, 1), (1, 1)],
                                 dimension_numbers=dn,
                                 preferred_element_type=jnp.float32)
    B, Cout, T, H, W = y.shape
    Cf = Cout // 4
    y7 = y.reshape(B, Cf, 2, 2, T, H, W)
    return jnp.transpose(y7, (0, 1, 4, 5, 2, 6, 3)).reshape(B, Cf, T, 2 * H, 2 * W)


if __name__ == "__main__":
    key = jax.random.PRNGKey(0)
    n_feat = 4
    B, T, H, W = 2, 4, 16, 16

    kx, kw_ = jax.random.split(key)
    x = jax.random.normal(kx, (B, n_feat, T, H, W), dtype=jnp.float32)
    # Conv3d weight: [out_channels=2*n_feat, in_channels=n_feat, 3, 3, 3]
    weight = 0.1 * jax.random.normal(kw_, (2 * n_feat, n_feat, 3, 3, 3),
                                     dtype=jnp.float32)

    fwd = jax.jit(upsample_forward, static_argnames=("t_tile",))
    out = jax.block_until_ready(fwd(x, weight))
    assert out.shape == (B, n_feat // 2, T, 2 * H, 2 * W), out.shape

    # Apples-to-apples check: reference on bf16-quantized operands (the kernel
    # computes bf16 x bf16 -> f32 on the MXU), tight tolerance.
    xq = x.astype(jnp.bfloat16).astype(jnp.float32)
    wq = weight.astype(jnp.bfloat16).astype(jnp.float32)
    ref_q = upsample_reference(xq, wq)
    assert jnp.allclose(out, ref_q, atol=2e-3, rtol=2e-3), \
        float(jnp.max(jnp.abs(out - ref_q)))

    # Sanity vs the exact f32 reference (tolerance covers bf16 operand rounding).
    ref = upsample_reference(x, weight)
    assert jnp.allclose(out, ref, atol=6e-2, rtol=6e-2), \
        float(jnp.max(jnp.abs(out - ref)))

    print("KERNEL_OK")
</pallas_src>

<mosaic_0001>
module attributes {stable_mosaic.version = 11 : i64} {
  func.func @kernel(%arg0: i32, %arg1: i32, %arg2: memref<1x6x18x128xbf16, #tpu.memory_space<vmem>>, %arg3: memref<3x3x128x128xbf16, #tpu.memory_space<vmem>>, %arg4: memref<1x4x16x128xf32, #tpu.memory_space<vmem>>) attributes {dimension_semantics = [#tpu.dimension_semantics<parallel>, #tpu.dimension_semantics<parallel>], iteration_bounds = array<i64: 2, 1>, scalar_prefetch = 0 : i64, scratch_operands = 0 : i64, tpu.core_type = #tpu.core_type<tc>, window_params = [{transform_indices = @transform_0, window_bounds = array<i64: 1, 6, 18, 128>}, {pipeline_mode = #tpu.pipeline_mode<synchronous>, transform_indices = @transform_1, window_bounds = array<i64: 3, 3, 128, 128>}, {transform_indices = @transform_2, window_bounds = array<i64: 1, 4, 16, 128>}]} {
    %c4_i32 = arith.constant 4 : i32
    %0 = arith.muli %arg1, %c4_i32 : i32
    %cst = arith.constant 0.000000e+00 : f32
    %1 = vector.broadcast %cst : f32 to vector<64x128xf32>
    %c0_i32 = arith.constant 0 : i32
    %2 = arith.addi %0, %c0_i32 : i32
    %c0 = arith.constant 0 : index
    %3 = arith.index_cast %2 : i32 to index
    %c0_0 = arith.constant 0 : index
    %c0_1 = arith.constant 0 : index
    %4 = vector.load %arg2[%c0, %3, %c0_0, %c0_1] : memref<1x6x18x128xbf16, #tpu.memory_space<vmem>>, vector<1x4x18x128xbf16>
    %5 = vector.shape_cast %4 : vector<1x4x18x128xbf16> to vector<4x18x128xbf16>
    %6 = vector.extract_strided_slice %5 {offsets = [0, 0, 0], sizes = [4, 16, 128], strides = [1, 1, 1]} : vector<4x18x128xbf16> to vector<4x16x128xbf16>
    %7 = vector.shape_cast %6 : vector<4x16x128xbf16> to vector<64x128xbf16>
    %c0_2 = arith.constant 0 : index
    %c0_3 = arith.constant 0 : index
    %c0_4 = arith.constant 0 : index
    %c0_5 = arith.constant 0 : index
    %8 = vector.load %arg3[%c0_2, %c0_3, %c0_4, %c0_5] : memref<3x3x128x128xbf16, #tpu.memory_space<vmem>>, vector<1x1x128x128xbf16>
    %9 = vector.shape_cast %8 : vector<1x1x128x128xbf16> to vector<128x128xbf16>
    %cst_6 = arith.constant dense<0.000000e+00> : vector<64x128xf32>
    %10 = tpu.matmul %7, %9, %cst_6 {dimension_numbers = #tpu.dot_dimension_numbers<[1], [0], [0], [1], [0, 0, 1, 1], [], []>} : vector<64x128xbf16>, vector<128x128xbf16>, vector<64x128xf32> -> vector<64x128xf32>
    %11 = arith.addf %1, %10 : vector<64x128xf32>
    %12 = vector.extract_strided_slice %5 {offsets = [0, 1, 0], sizes = [4, 16, 128], strides = [1, 1, 1]} : vector<4x18x128xbf16> to vector<4x16x128xbf16>
    %13 = vector.shape_cast %12 : vector<4x16x128xbf16> to vector<64x128xbf16>
    %c0_7 = arith.constant 0 : index
    %c1 = arith.constant 1 : index
    %c0_8 = arith.constant 0 : index
    %c0_9 = arith.constant 0 : index
    %14 = vector.load %arg3[%c0_7, %c1, %c0_8, %c0_9] : memref<3x3x128x128xbf16, #tpu.memory_space<vmem>>, vector<1x1x128x128xbf16>
    %15 = vector.shape_cast %14 : vector<1x1x128x128xbf16> to vector<128x128xbf16>
    %cst_10 = arith.constant dense<0.000000e+00> : vector<64x128xf32>
    %16 = tpu.matmul %13, %15, %cst_10 {dimension_numbers = #tpu.dot_dimension_numbers<[1], [0], [0], [1], [0, 0, 1, 1], [], []>} : vector<64x128xbf16>, vector<128x128xbf16>, vector<64x128xf32> -> vector<64x128xf32>
    %17 = arith.addf %11, %16 : vector<64x128xf32>
    %18 = vector.extract_strided_slice %5 {offsets = [0, 2, 0], sizes = [4, 16, 128], strides = [1, 1, 1]} : vector<4x18x128xbf16> to vector<4x16x128xbf16>
    %19 = vector.shape_cast %18 : vector<4x16x128xbf16> to vector<64x128xbf16>
    %c0_11 = arith.constant 0 : index
    %c2 = arith.constant 2 : index
    %c0_12 = arith.constant 0 : index
    %c0_13 = arith.constant 0 : index
    %20 = vector.load %arg3[%c0_11, %c2, %c0_12, %c0_13] : memref<3x3x128x128xbf16, #tpu.memory_space<vmem>>, vector<1x1x128x128xbf16>
    %21 = vector.shape_cast %20 : vector<1x1x128x128xbf16> to vector<128x128xbf16>
    %cst_14 = arith.constant dense<0.000000e+00> : vector<64x128xf32>
    %22 = tpu.matmul %19, %21, %cst_14 {dimension_numbers = #tpu.dot_dimension_numbers<[1], [0], [0], [1], [0, 0, 1, 1], [], []>} : vector<64x128xbf16>, vector<128x128xbf16>, vector<64x128xf32> -> vector<64x128xf32>
    %23 = arith.addf %17, %22 : vector<64x128xf32>
    %c1_i32 = arith.constant 1 : i32
    %24 = arith.addi %0, %c1_i32 : i32
    %c0_15 = arith.constant 0 : index
    %25 = arith.index_cast %24 : i32 to index
    %c0_16 = arith.constant 0 : index
    %c0_17 = arith.constant 0 : index
    %26 = vector.load %arg2[%c0_15, %25, %c0_16, %c0_17] : memref<1x6x18x128xbf16, #tpu.memory_space<vmem>>, vector<1x4x18x128xbf16>
    %27 = vector.shape_cast %26 : vector<1x4x18x128xbf16> to vector<4x18x128xbf16>
    %28 = vector.extract_strided_slice %27 {offsets = [0, 0, 0], sizes = [4, 16, 128], strides = [1, 1, 1]} : vector<4x18x128xbf16> to vector<4x16x128xbf16>
    %29 = vector.shape_cast %28 : vector<4x16x128xbf16> to vector<64x128xbf16>
    %c1_18 = arith.constant 1 : index
    %c0_19 = arith.constant 0 : index
    %c0_20 = arith.constant 0 : index
    %c0_21 = arith.constant 0 : index
    %30 = vector.load %arg3[%c1_18, %c0_19, %c0_20, %c0_21] : memref<3x3x128x128xbf16, #tpu.memory_space<vmem>>, vector<1x1x128x128xbf16>
    %31 = vector.shape_cast %30 : vector<1x1x128x128xbf16> to vector<128x128xbf16>
    %cst_22 = arith.constant dense<0.000000e+00> : vector<64x128xf32>
    %32 = tpu.matmul %29, %31, %cst_22 {dimension_numbers = #tpu.dot_dimension_numbers<[1], [0], [0], [1], [0, 0, 1, 1], [], []>} : vector<64x128xbf16>, vector<128x128xbf16>, vector<64x128xf32> -> vector<64x128xf32>
    %33 = arith.addf %23, %32 : vector<64x128xf32>
    %34 = vector.extract_strided_slice %27 {offsets = [0, 1, 0], sizes = [4, 16, 128], strides = [1, 1, 1]} : vector<4x18x128xbf16> to vector<4x16x128xbf16>
    %35 = vector.shape_cast %34 : vector<4x16x128xbf16> to vector<64x128xbf16>
    %c1_23 = arith.constant 1 : index
    %c1_24 = arith.constant 1 : index
    %c0_25 = arith.constant 0 : index
    %c0_26 = arith.constant 0 : index
    %36 = vector.load %arg3[%c1_23, %c1_24, %c0_25, %c0_26] : memref<3x3x128x128xbf16, #tpu.memory_space<vmem>>, vector<1x1x128x128xbf16>
    %37 = vector.shape_cast %36 : vector<1x1x128x128xbf16> to vector<128x128xbf16>
    %cst_27 = arith.constant dense<0.000000e+00> : vector<64x128xf32>
    %38 = tpu.matmul %35, %37, %cst_27 {dimension_numbers = #tpu.dot_dimension_numbers<[1], [0], [0], [1], [0, 0, 1, 1], [], []>} : vector<64x128xbf16>, vector<128x128xbf16>, vector<64x128xf32> -> vector<64x128xf32>
    %39 = arith.addf %33, %38 : vector<64x128xf32>
    %40 = vector.extract_strided_slice %27 {offsets = [0, 2, 0], sizes = [4, 16, 128], strides = [1, 1, 1]} : vector<4x18x128xbf16> to vector<4x16x128xbf16>
    %41 = vector.shape_cast %40 : vector<4x16x128xbf16> to vector<64x128xbf16>
    %c1_28 = arith.constant 1 : index
    %c2_29 = arith.constant 2 : index
    %c0_30 = arith.constant 0 : index
    %c0_31 = arith.constant 0 : index
    %42 = vector.load %arg3[%c1_28, %c2_29, %c0_30, %c0_31] : memref<3x3x128x128xbf16, #tpu.memory_space<vmem>>, vector<1x1x128x128xbf16>
    %43 = vector.shape_cast %42 : vector<1x1x128x128xbf16> to vector<128x128xbf16>
    %cst_32 = arith.constant dense<0.000000e+00> : vector<64x128xf32>
    %44 = tpu.matmul %41, %43, %cst_32 {dimension_numbers = #tpu.dot_dimension_numbers<[1], [0], [0], [1], [0, 0, 1, 1], [], []>} : vector<64x128xbf16>, vector<128x128xbf16>, vector<64x128xf32> -> vector<64x128xf32>
    %45 = arith.addf %39, %44 : vector<64x128xf32>
    %c2_i32 = arith.constant 2 : i32
    %46 = arith.addi %0, %c2_i32 : i32
    %c0_33 = arith.constant 0 : index
    %47 = arith.index_cast %46 : i32 to index
    %c0_34 = arith.constant 0 : index
    %c0_35 = arith.constant 0 : index
    %48 = vector.load %arg2[%c0_33, %47, %c0_34, %c0_35] : memref<1x6x18x128xbf16, #tpu.memory_space<vmem>>, vector<1x4x18x128xbf16>
    %49 = vector.shape_cast %48 : vector<1x4x18x128xbf16> to vector<4x18x128xbf16>
    %50 = vector.extract_strided_slice %49 {offsets = [0, 0, 0], sizes = [4, 16, 128], strides = [1, 1, 1]} : vector<4x18x128xbf16> to vector<4x16x128xbf16>
    %51 = vector.shape_cast %50 : vector<4x16x128xbf16> to vector<64x128xbf16>
    %c2_36 = arith.constant 2 : index
    %c0_37 = arith.constant 0 : index
    %c0_38 = arith.constant 0 : index
    %c0_39 = arith.constant 0 : index
    %52 = vector.load %arg3[%c2_36, %c0_37, %c0_38, %c0_39] : memref<3x3x128x128xbf16, #tpu.memory_space<vmem>>, vector<1x1x128x128xbf16>
    %53 = vector.shape_cast %52 : vector<1x1x128x128xbf16> to vector<128x128xbf16>
    %cst_40 = arith.constant dense<0.000000e+00> : vector<64x128xf32>
    %54 = tpu.matmul %51, %53, %cst_40 {dimension_numbers = #tpu.dot_dimension_numbers<[1], [0], [0], [1], [0, 0, 1, 1], [], []>} : vector<64x128xbf16>, vector<128x128xbf16>, vector<64x128xf32> -> vector<64x128xf32>
    %55 = arith.addf %45, %54 : vector<64x128xf32>
    %56 = vector.extract_strided_slice %49 {offsets = [0, 1, 0], sizes = [4, 16, 128], strides = [1, 1, 1]} : vector<4x18x128xbf16> to vector<4x16x128xbf16>
    %57 = vector.shape_cast %56 : vector<4x16x128xbf16> to vector<64x128xbf16>
    %c2_41 = arith.constant 2 : index
    %c1_42 = arith.constant 1 : index
    %c0_43 = arith.constant 0 : index
    %c0_44 = arith.constant 0 : index
    %58 = vector.load %arg3[%c2_41, %c1_42, %c0_43, %c0_44] : memref<3x3x128x128xbf16, #tpu.memory_space<vmem>>, vector<1x1x128x128xbf16>
    %59 = vector.shape_cast %58 : vector<1x1x128x128xbf16> to vector<128x128xbf16>
    %cst_45 = arith.constant dense<0.000000e+00> : vector<64x128xf32>
    %60 = tpu.matmul %57, %59, %cst_45 {dimension_numbers = #tpu.dot_dimension_numbers<[1], [0], [0], [1], [0, 0, 1, 1], [], []>} : vector<64x128xbf16>, vector<128x128xbf16>, vector<64x128xf32> -> vector<64x128xf32>
    %61 = arith.addf %55, %60 : vector<64x128xf32>
    %62 = vector.extract_strided_slice %49 {offsets = [0, 2, 0], sizes = [4, 16, 128], strides = [1, 1, 1]} : vector<4x18x128xbf16> to vector<4x16x128xbf16>
    %63 = vector.shape_cast %62 : vector<4x16x128xbf16> to vector<64x128xbf16>
    %c2_46 = arith.constant 2 : index
    %c2_47 = arith.constant 2 : index
    %c0_48 = arith.constant 0 : index
    %c0_49 = arith.constant 0 : index
    %64 = vector.load %arg3[%c2_46, %c2_47, %c0_48, %c0_49] : memref<3x3x128x128xbf16, #tpu.memory_space<vmem>>, vector<1x1x128x128xbf16>
    %65 = vector.shape_cast %64 : vector<1x1x128x128xbf16> to vector<128x128xbf16>
    %cst_50 = arith.constant dense<0.000000e+00> : vector<64x128xf32>
    %66 = tpu.matmul %63, %65, %cst_50 {dimension_numbers = #tpu.dot_dimension_numbers<[1], [0], [0], [1], [0, 0, 1, 1], [], []>} : vector<64x128xbf16>, vector<128x128xbf16>, vector<64x128xf32> -> vector<64x128xf32>
    %67 = arith.addf %61, %66 : vector<64x128xf32>
    %68 = vector.shape_cast %67 : vector<64x128xf32> to vector<4x16x128xf32>
    %c0_51 = arith.constant 0 : index
    %c0_52 = arith.constant 0 : index
    %c0_53 = arith.constant 0 : index
    %c0_54 = arith.constant 0 : index
    %69 = vector.load %arg4[%c0_51, %c0_52, %c0_53, %c0_54] : memref<1x4x16x128xf32, #tpu.memory_space<vmem>>, vector<1x4x16x128xf32>
    %70 = vector.shape_cast %69 : vector<1x4x16x128xf32> to vector<4x16x128xf32>
    %71 = vector.shape_cast %68 : vector<4x16x128xf32> to vector<1x4x16x128xf32>
    tpu.vector_store %arg4[%c0_51, %c0_52, %c0_53, %c0_54], %71 {strides = array<i32>} : memref<1x4x16x128xf32, #tpu.memory_space<vmem>>, vector<1x4x16x128xf32>,
    return
  }
  func.func @transform_0(%arg0: i32, %arg1: i32) -> (i32, i32, i32, i32) {
    %c0_i32 = arith.constant 0 : i32
    %c0_i32_0 = arith.constant 0 : i32
    %c0_i32_1 = arith.constant 0 : i32
    %c0_i32_2 = arith.constant 0 : i32
    return %arg0, %c0_i32, %c0_i32_0, %c0_i32_1 : i32, i32, i32, i32
  }
  func.func @transform_1(%arg0: i32, %arg1: i32) -> (i32, i32, i32, i32) {
    %c0_i32 = arith.constant 0 : i32
    %c0_i32_0 = arith.constant 0 : i32
    %c0_i32_1 = arith.constant 0 : i32
    %c0_i32_2 = arith.constant 0 : i32
    %c0_i32_3 = arith.constant 0 : i32
    return %c0_i32, %c0_i32_0, %c0_i32_1, %c0_i32_2 : i32, i32, i32, i32
  }
  func.func @transform_2(%arg0: i32, %arg1: i32) -> (i32, i32, i32, i32) {
    %c0_i32 = arith.constant 0 : i32
    %c0_i32_0 = arith.constant 0 : i32
    %c0_i32_1 = arith.constant 0 : i32
    return %arg0, %arg1, %c0_i32, %c0_i32_0 : i32, i32, i32, i32
  }
}

</mosaic_0001>

<bundles_post_ra>
// kernel: upsample_forward.1
= control target key start
LH: loop header
LB: loop body
LE: loop exit
PB: predicated region body
PF: predicated region fallthrough
CT: control target
= control target key end

     0   :  { %s2877_s9 = smov 0   ;;  %s2879_s10 = smov 0   ;;  %s3519_s0 = inlined_call_operand.vmem [shape: bf16[2,6,18,128], index: 0, kind: input, shape index: {}]   ;;  %s3520_s1 = inlined_call_operand.vmem [shape: bf16[3,3,128,128], index: 1, kind: input, shape index: {}]   ;;  %s3521_s2 = inlined_call_operand.vmem [shape: f32[2,4,16,128], index: 2, kind: output, shape index: {}]  }
   0x1   :  { %s2881_s11 = smov 0  }
   0x2 LB: > { %s24_s12 = sadd.s32 1, %s2856_s10  ;;  %p2110_p0 = scmp.ge.s32.totalorder %s2860_s11, 1  ;;  %s2860_s11 = sphi %s2881_s11, %s12_s11   ;;  %s2856_s10 = sphi %s2879_s10, %s3535_s10   ;;  %s2852_s9 = sphi %s2877_s9, %s3534_s9  }
   0x3   : > { %p26_p1 = scmp.ge.s32.totalorder %s24_s12, 2  ;;  %p126_p2 = scmp.lt.s32.totalorder %s2860_s11, 3 }
   0x5   : > { %s3537_s12 = smov (%p26_p1, %s24_s12), 0  ;;  %p127_p3 = pnand %p2110_p0, %p126_p2 }
   0x7   : > { %130 = sbr.rel (%p127_p3) target bundleno = 376 (0x178), region = 28 }
   0xc   : > { %v2754_v0 = vld [vmem:[%s3520_s1 + $0x78] sm:$0xff]   ;;  %p153_p4 = scmp.lt.s32.totalorder %s2852_s9, 1  ;;  %v2756_v2 = vld [vmem:[%s3520_s1 + $0x70] sm:$0xff]   ;;  %v2758_v4 = vld [vmem:[%s3520_s1 + $0x68] sm:$0xff]   ;;  %vm202_vm0 = vsmask.f32 3328 }
   0xd   : > { %v2755_v1 = vld [vmem:[%s3520_s1 + $0x38] sm:$0xff]   ;;  %2497 = vmatprep.subr.bf16.mxu0 %v2754_v0  ;;  %v2757_v3 = vld [vmem:[%s3520_s1 + $0x30] sm:$0xff]   ;;  %v2759_v5 = vld [vmem:[%s3520_s1 + $0x28] sm:$0xff]   ;;  %vm203_vm1 = vsmask.f32 7440  ;;  %vm588_vm3 = vcmask 1042432  }
   0xe   : > { %2521 = vmatprep.subr.bf16.mxu1 %v2755_v1  ;;  %2498 = vmatpush3.bf16.msra.mxu0 %v2754_v0  ;;  %s3539_s9 = smov (!%p153_p4, %s2852_s9), 1  ;;  %v2760_v6 = vld [vmem:[%s3520_s1 + $0x60] sm:$0xff]   ;;  %v2762_v8 = vld [vmem:[%s3520_s1 + $0x58] sm:$0xff]   ;;  %v2764_v10 = vld [vmem:[%s3520_s1 + $0x50] sm:$0xff]   ;;  %vm589_vm4 = vcmask 1046532  }
   0xf   : > { %2522 = vmatpush3.bf16.msra.mxu1 %v2755_v1  ;;  %2499 = vmatprep.subr.bf16.mxu0 %v2756_v2  ;;  %v2761_v7 = vld [vmem:[%s3520_s1 + $0x20] sm:$0xff]   ;;  %s2729_s29 = smul.u32 72, %s3539_s9  ;;  %v2763_v9 = vld [vmem:[%s3520_s1 + $0x18] sm:$0xff]   ;;  %v2765_v11 = vld [vmem:[%s3520_s1 + $0x10] sm:$0xff]   ;;  %s2388_s21 = sshll.u32 %s3539_s9, 6 }
  0x10   : > { %2523 = vmatprep.subr.bf16.mxu1 %v2757_v3  ;;  %v2766_v26 = vld [vmem:[%s3520_s1 + $0x48] sm:$0xff]   ;;  %vm2976_vm2 = vmor %vm202_vm0, %vm203_vm1  ;;  %v2768_v44 = vld [vmem:[%s3520_s1 + $0x40] sm:$0xff]   ;;  %s3497_s24 = scalar_lea.vmem %s3521_s2, %s2388_s21 }
  0x11   : > { %s2931_s8 = scalar_lea.vmem %s3519_s0, %s2729_s29  ;;  %v2767_v30 = vld [vmem:[%s3520_s1 + $0x8] sm:$0xff]   ;;  %v2769_v46 = vld [vmem:[%s3520_s1] sm:$0xff]   ;;  %v2772_v55 = vld [vmem:[%s3520_s1 + $0xb8] sm:$0xff]  }
  0x12   : > { %2500 = vmatpush3.bf16.msra.mxu0 %v2756_v2  ;;  %v2940_v12 = vld [vmem:[%s2931_s8] sm:$0xf]  ;;  %v2943_v13 = vld [vmem:[%s2931_s8 + $0x4] sm:$0xf]  ;;  %v2946_v14 = vld [vmem:[%s2931_s8 + $0x8] sm:$0x1] }
  0x13   : > { %2524 = vmatpush3.bf16.msra.mxu1 %v2757_v3  ;;  %2501 = vmatprep.subr.bf16.mxu0 %v2758_v4  ;;  %v206_v15 = vshrl.u32 %v2940_v12, 16  ;;  %v209_v16 = vshll.u32 %v2940_v12, 16  ;;  %v215_v17 = vshll.u32 %v2943_v13, 16  ;;  %v219_v18 = vshrl.u32 %v2943_v13, 16  ;;  %v2954_v20 = vld [vmem:[%s2931_s8 + $0xc] sm:$0xf]  ;;  %vm3052_vm5 = vmor %vm588_vm3, %vm589_vm4 }
  0x14   : > { %2525 = vmatprep.subr.bf16.mxu1 %v2759_v5  ;;  %v225_v19 = vshll.u32 %v2946_v14, 16  ;;  %v2142_v23 = vcombine.low %v2940_v12, %v2943_v13  ;;  %v2959_v24 = vld [vmem:[%s2931_s8 + $0x10] sm:$0xf]  ;;  %v2962_v25 = vld [vmem:[%s2931_s8 + $0x14] sm:$0x1]  ;;  %v230_v29 = vshrl.u32 %v2954_v20, 16 }
  0x15   : > { %v208_v21 = vrot.slane %v206_v15, 4  ;;  %v211_v22 = vrot.slane %v209_v16, 5  ;;  %v217_v27 = vrot.slane %v215_v17, 5  ;;  %v221_v28 = vrot.slane %v219_v18, 4  ;;  %v2773_v58 = vld [vmem:[%s3520_s1 + $0xf8] sm:$0xff]   ;;  %v2774_v62 = vld [vmem:[%s3520_s1 + $0xb0] sm:$0xff]  }
  0x16   : > { %2502 = vmatpush3.bf16.msra.mxu0 %v2758_v4  ;;  %2537 = vmatprep.mubr.bf16.mxu1 %v2142_v23  ;;  %v233_v32 = vshll.u32 %v2954_v20, 16  ;;  %v239_v33 = vshll.u32 %v2959_v24, 16  ;;  %v243_v34 = vshrl.u32 %v2959_v24, 16  ;;  %v227_v37 = vrot.slane %v225_v19, 5  ;;  %v2775_v0 = vld [vmem:[%s3520_s1 + $0xf0] sm:$0xff]   ;;  %v2777_v16 = vld [vmem:[%s3520_s1 + $0xe8] sm:$0xff]  }
  0x17   : > { %2526 = vmatpush3.bf16.msra.mxu1 %v2759_v5  ;;  %2503 = vmatprep.subr.bf16.mxu0 %v2760_v6  ;;  %v212_v31 = vor.u32 %v211_v22, %v208_v21  ;;  %v222_v36 = vor.u32 %v221_v28, %v217_v27  ;;  %v232_v38 = vrot.slane %v230_v29, 4  ;;  %v249_v39 = vshll.u32 %v2962_v25, 16  ;;  %v3012_v1 = vld [vmem:[%s2931_s8 + $0x18] sm:$0xf]  ;;  %v3015_v2 = vld [vmem:[%s2931_s8 + $0x1c] sm:$0xf] }
  0x18   : > { %2527 = vmatprep.subr.bf16.mxu1 %v2761_v7  ;;  %v235_v41 = vrot.slane %v233_v32, 5  ;;  %v241_v42 = vrot.slane %v239_v33, 5  ;;  %v245_v43 = vrot.slane %v243_v34, 4  ;;  %v596_v59 = vrot.slane %v2946_v14, 5  ;;  %v3019_v4 = vld [vmem:[%s2931_s8 + $0x20] sm:$0x1] }
  0x19   : > { %v213_v40 = vrot.slane %v212_v31, 4  ;;  %v223_v45 = vrot.slane %v222_v36, 4  ;;  %v251_v50 = vrot.slane %v249_v39, 5  ;;  %v2143_v61 = vcombine.low %v2954_v20, %v2959_v24  ;;  %v3035_v15 = vld [vmem:[%s2931_s8 + $0x28] sm:$0xf]  ;;  %v2781_v14 = vld [vmem:[%s3520_s1 + $0xd8] sm:$0xff]  }
  0x1a   : > { %2504 = vmatpush3.bf16.msra.mxu0 %v2760_v6  ;;  %v236_v48 = vor.u32 %v235_v41, %v232_v38  ;;  %v246_v49 = vor.u32 %v245_v43, %v241_v42  ;;  %v2154_v63 = vrot.slane %v2940_v12, 9  ;;  %v593_v3 = vrot.slane %v2943_v13, 5  ;;  %v3032_v13 = vld [vmem:[%s2931_s8 + $0x24] sm:$0xf]  ;;  %v3041_v22 = vld [vmem:[%s2931_s8 + $0x2c] sm:$0x1] }
  0x1b   : > { %2528 = vmatpush3.bf16.msra.mxu1 %v2761_v7  ;;  %2505 = vmatprep.subr.bf16.mxu0 %v2762_v8  ;;  %v218_v47 = vsel %vm2976_vm2, %v213_v40, %v217_v27  ;;  %v228_v51 = vsel %vm2976_vm2, %v223_v45, %v227_v37  ;;  %v254_v5 = vshrl.u32 %v3012_v1, 16  ;;  %v257_v6 = vshll.u32 %v3012_v1, 16  ;;  %v2778_v43 = vld [vmem:[%s3520_s1 + $0xa0] sm:$0xff]   ;;  %v3083_v12 = vld [vmem:[%s2931_s8 + $0x10] sm:$0xf] }
  0x1c   : > { %2529 = vmatprep.subr.bf16.mxu1 %v2763_v9  ;;  %v2130_v52 = vcombine.low %v218_v47, %v228_v51  ;;  %v237_v53 = vrot.slane %v236_v48, 4  ;;  %v247_v54 = vrot.slane %v246_v49, 4  ;;  %v263_v7 = vshll.u32 %v3015_v2, 16  ;;  %v2779_v45 = vld [vmem:[%s3520_s1 + $0xe0] sm:$0xff]  }
  0x1d   : > { %v256_v17 = vrot.slane %v254_v5, 4  ;;  %v259_v18 = vrot.slane %v257_v6, 5  ;;  %v281_v27 = vshll.u32 %v3032_v13, 16  ;;  %v287_v28 = vshll.u32 %v3035_v15, 16  ;;  %v2786_v5 = vld [vmem:[%s3520_s1 + $0x88] sm:$0xff]  }
  0x1e   : > { %2506 = vmatpush3.bf16.msra.mxu0 %v2762_v8  ;;  %2513 = vmatprep.mubr.bf16.mxu0 %v2130_v52  ;;  %v242_v56 = vsel %vm2976_vm2, %v237_v53, %v241_v42  ;;  %v252_v57 = vsel %vm2976_vm2, %v247_v54, %v251_v50  ;;  %v267_v8 = vshrl.u32 %v3015_v2, 16  ;;  %v265_v19 = vrot.slane %v263_v7, 5  ;;  %v2787_v7 = vld [vmem:[%s3520_s1 + $0xc8] sm:$0xff]  }
  0x1f   : > { %2530 = vmatpush3.bf16.msra.mxu1 %v2763_v9  ;;  %2507 = vmatprep.subr.bf16.mxu0 %v2764_v10  ;;  %v2131_v60 = vcombine.low %v242_v56, %v252_v57  ;;  %v2776_v9 = vld [vmem:[%s3520_s1 + $0xa8] sm:$0xff]   ;;  %v260_v29 = vor.u32 %v259_v18, %v256_v17  ;;  %v291_v31 = vshrl.u32 %v3035_v15, 16  ;;  %v297_v32 = vshll.u32 %v3041_v22, 16  ;;  %v2780_v56 = vld [vmem:[%s3520_s1 + $0x98] sm:$0xff]  }
  0x20   : > { %2531 = vmatprep.subr.bf16.mxu1 %v2765_v11  ;;  %v269_v21 = vrot.slane %v267_v8, 4  ;;  %v283_v34 = vrot.slane %v281_v27, 5  ;;  %v289_v36 = vrot.slane %v287_v28, 5  ;;  %v595_v37 = vrot.slane %v593_v3, 4  ;;  %v3129_v27 = vld [vmem:[%s2931_s8 + $0x1c] sm:$0xf] }
  0x21   : > { %v261_v38 = vrot.slane %v260_v29, 4  ;;  %v293_v40 = vrot.slane %v291_v31, 4  ;;  %v2145_v41 = vcombine.low %v3032_v13, %v3035_v15  ;;  %v299_v49 = vrot.slane %v297_v32, 5  ;;  %v2793_v28 = vld [vmem:[%s3520_s1 + $0x178] sm:$0xff]  }
  0x22   : > { %2508 = vmatpush3.bf16.msra.mxu0 %v2764_v10  ;;  %v273_v10 = vshll.u32 %v3019_v4, 16  ;;  %v594_v53 = vsel %vm3052_vm5, %v2154_v63, %v593_v3  ;;  %v597_v54 = vsel %vm3052_vm5, %v595_v37, %v596_v59  ;;  %v2785_v63 = vld [vmem:[%s3520_s1 + $0xd0] sm:$0xff]   ;;  %v603_v3 = vrot.slane %v2962_v25, 5 }
  0x23   : > { %2532 = vmatpush3.bf16.msra.mxu1 %v2765_v11  ;;  %2509 = vmatprep.subr.bf16.mxu0 %v2766_v26  ;;  %v2144_v11 = vcombine.low %v3012_v1, %v3015_v2  ;;  %v294_v48 = vor.u32 %v293_v40, %v289_v36  ;;  %v2155_v6 = vrot.slane %v2954_v20, 9  ;;  %v607_v25 = vrot.slane %v3015_v2, 5 }
  0x24   : > { %2533 = vmatprep.subr.bf16.mxu1 %v2767_v30  ;;  %v275_v23 = vrot.slane %v273_v10, 5  ;;  %v2788_v10 = vld [vmem:[%s3520_s1 + $0x80] sm:$0xff]   ;;  %v610_v17 = vrot.slane %v3019_v4, 5  ;;  %v614_v2 = vrot.slane %v3035_v15, 5  ;;  %v2792_v4 = vld [vmem:[%s3520_s1 + $0x138] sm:$0xff]   ;;  %v961_v15 = vshll.u32 %v3083_v12, 16 }
  0x25   : > { %v295_v52 = vrot.slane %v294_v48, 4  ;;  %v609_v18 = vrot.slane %v607_v25, 4  ;;  %v617_v29 = vrot.slane %v3041_v22, 5 }
  0x26   : > { %2510 = vmatpush3.bf16.msra.mxu0 %v2766_v26  ;;  %v278_v26 = vshrl.u32 %v3032_v13, 16  ;;  %v616_v31 = vrot.slane %v614_v2, 4  ;;  %v963_v32 = vrot.slane %v961_v15, 5 }
  0x27   : > { %2534 = vmatpush3.bf16.msra.mxu1 %v2767_v30  ;;  %2511 = vmatprep.subr.bf16.mxu0 %v2768_v44  ;;  %v270_v30 = vor.u32 %v269_v21, %v265_v19  ;;  %v611_v37 = vsel %vm3052_vm5, %v609_v18, %v610_v17 }
  0x28   : > { %2535 = vmatprep.subr.bf16.mxu1 %v2769_v46  ;;  %v280_v33 = vrot.slane %v278_v26, 4  ;;  %v3126_v26 = vld [vmem:[%s2931_s8 + $0x18] sm:$0xf] }
  0x29   : > { %v271_v39 = vrot.slane %v270_v30, 4  ;;  %v2215_v40 = vcombine.low %v3126_v26, %v3129_v27 }
  0x2a   : > { %2512 = vmatpush3.bf16.msra.mxu0 %v2768_v44  ;;  %v284_v44 = vor.u32 %v283_v34, %v280_v33  ;;  %v3140_v34 = vld [vmem:[%s2931_s8 + $0x24] sm:$0xf] }
  0x2b   : > { %2536 = vmatpush3.bf16.msra.mxu1 %v2769_v46  ;;  %2545 = vmatprep.subr.bf16.mxu0 %v2772_v55  ;;  %v266_v46 = vsel %vm2976_vm2, %v261_v38, %v265_v19  ;;  %v276_v47 = vsel %vm2976_vm2, %v271_v39, %v275_v23  ;;  %v3147_v38 = vld [vmem:[%s2931_s8 + $0x28] sm:$0xf] }
  0x2c   : > { %2569 = vmatprep.subr.bf16.mxu1 %v2773_v58  ;;  %v2132_v50 = vcombine.low %v266_v46, %v276_v47  ;;  %v285_v51 = vrot.slane %v284_v44, 4  ;;  %v979_v44 = vshll.u32 %v3126_v26, 16  ;;  %v2188_v46 = vld [vmem:[%s2931_s8 + $0x14] sm:$0x1] }
  0x2d   : > { %2514 = vmatmul.mubr.bf16.vlgmr.msra.gmra.mxu0 %v2131_v60  ;;  %v2795_v47 = vld [vmem:[%s3520_s1 + $0x170] sm:$0xff]  }
  0x2e   : > { %2538 = vmatmul.mubr.bf16.vlgmr.msra.gmra.mxu1 %v2143_v61  ;;  %2546 = vmatpush3.bf16.msra.mxu0 %v2772_v55  ;;  %v3075_v55 = vld [vmem:[%s2931_s8 + $0xc] sm:$0xf]  ;;  %v290_v57 = vsel %vm2976_vm2, %v285_v51, %v289_v36  ;;  %v2174_v61 = vcombine.low %v594_v53, %v597_v54  ;;  %v971_v51 = vshll.u32 %v2188_v46, 16  ;;  %v2216_v53 = vcombine.low %v3140_v34, %v3147_v38  ;;  %v3171_v54 = vld [vmem:[%s2931_s8 + $0x34] sm:$0xf] }
  0x2f   : > { %2570 = vmatpush3.bf16.msra.mxu1 %v2773_v58  ;;  %2547 = vmatprep.subr.bf16.mxu0 %v2774_v62  ;;  %v300_v58 = vsel %vm2976_vm2, %v295_v52, %v299_v49  ;;  %v2214_v59 = vcombine.low %v3075_v55, %v3083_v12  ;;  %v952_v8 = vshrl.u32 %v3075_v55, 16  ;;  %v955_v20 = vshll.u32 %v3075_v55, 16 }
  0x30   : > { %2571 = vmatprep.subr.bf16.mxu1 %v2775_v0  ;;  %2541 = vmatprep.mubr.bf16.mxu1 %v2144_v11  ;;  %v2133_v60 = vcombine.low %v290_v57, %v300_v58  ;;  %v2789_v11 = vld [vmem:[%s3520_s1 + $0xc0] sm:$0xff]   ;;  %v618_v52 = vsel %vm3052_vm5, %v616_v31, %v617_v29  ;;  %v1009_v29 = vshll.u32 %v3147_v38, 16 }
  0x31   : > { %2517 = vmatprep.mubr.bf16.mxu0 %v2132_v50  ;;  %v954_v19 = vrot.slane %v952_v8, 4  ;;  %v3164_v50 = vld [vmem:[%s2931_s8 + $0x30] sm:$0xf]  ;;  %v3193_v8 = vld [vmem:[%s2931_s8 + $0x20] sm:$0x1] }
  0x32   : > { %2548 = vmatpush3.bf16.msra.mxu0 %v2774_v62  ;;  %v2784_v62 = vld [vmem:[%s3520_s1 + $0x90] sm:$0xff]   ;;  %v1027_v15 = vshll.u32 %v3164_v50, 16 }
  0x33   : > { %2572 = vmatpush3.bf16.msra.mxu1 %v2775_v0  ;;  %2549 = vmatprep.subr.bf16.mxu0 %v2776_v9  ;;  %v600_v0 = vrot.slane %v2959_v24, 5 }
  0x34   : > { %2573 = vmatprep.subr.bf16.mxu1 %v2777_v16 }
  0x35   : > { %2518 = vmatmul.mubr.bf16.gmra.mxu0 %v2133_v60  ;;  %v602_v24 = vrot.slane %v600_v0, 4  ;;  %v601_v21 = vsel %vm3052_vm5, %v2155_v6, %v600_v0  ;;  %v2796_v60 = vld [vmem:[%s3520_s1 + $0x128] sm:$0xff]  }
  0x36   : > { %2550 = vmatpush3.bf16.msra.mxu0 %v2776_v9  ;;  %2542 = vmatmul.mubr.bf16.gmra.mxu1 %v2145_v41  ;;  %v2156_v9 = vrot.slane %v3012_v1, 9  ;;  %v2157_v1 = vrot.slane %v3032_v13, 9  ;;  %v957_v13 = vrot.slane %v955_v20, 5  ;;  %v1207_v41 = vrot.slane %v3083_v12, 5 }
  0x37   : > { %2574 = vmatpush3.bf16.msra.mxu1 %v2777_v16  ;;  %2551 = vmatprep.subr.bf16.mxu0 %v2778_v43  ;;  %v965_v16 = vshrl.u32 %v3083_v12, 16  ;;  %v604_v23 = vsel %vm3052_vm5, %v602_v24, %v603_v3  ;;  %v973_v12 = vrot.slane %v971_v51, 5 }
  0x38   : > { %2575 = vmatprep.subr.bf16.mxu1 %v2779_v45  ;;  %2585 = vmatprep.mubr.bf16.mxu1 %v2214_v59  ;;  %v2175_v33 = vcombine.low %v601_v21, %v604_v23  ;;  %v608_v36 = vsel %vm3052_vm5, %v2156_v9, %v607_v25  ;;  %v958_v22 = vor.u32 %v957_v13, %v954_v19  ;;  %v1209_v58 = vrot.slane %v1207_v41, 4  ;;  %v2800_v25 = vld [vmem:[%s3520_s1 + $0x120] sm:$0xff]   ;;  %v2802_v13 = vld [vmem:[%s3520_s1 + $0x118] sm:$0xff]  }
  0x39   : > { %2561 = vmatprep.mubr.bf16.mxu0 %v2174_v61  ;;  %v967_v30 = vrot.slane %v965_v16, 4  ;;  %v2176_v48 = vcombine.low %v608_v36, %v611_v37  ;;  %v615_v49 = vsel %vm3052_vm5, %v2157_v1, %v614_v2  ;;  %v1210_v59 = vrot.slane %v2188_v46, 5  ;;  %v2805_v37 = vld [vmem:[%s3520_s1 + $0x150] sm:$0xff]  }
  0x3a   : > { %2552 = vmatpush3.bf16.msra.mxu0 %v2778_v43  ;;  %v976_v43 = vshrl.u32 %v3126_v26, 16  ;;  %v989_v61 = vshrl.u32 %v3129_v27, 16  ;;  %v981_v9 = vrot.slane %v979_v44, 5  ;;  %v995_v1 = vshll.u32 %v3193_v8, 16 }
  0x3b   : > { %2576 = vmatpush3.bf16.msra.mxu1 %v2779_v45  ;;  %2553 = vmatprep.subr.bf16.mxu0 %v2780_v56  ;;  %v968_v39 = vor.u32 %v967_v30, %v963_v32  ;;  %v2794_v45 = vld [vmem:[%s3520_s1 + $0x130] sm:$0xff]   ;;  %v1000_v2 = vshrl.u32 %v3140_v34, 16  ;;  %v1214_v19 = vrot.slane %v3129_v27, 5  ;;  %v1003_v21 = vshll.u32 %v3140_v34, 16 }
  0x3c   : > { %2577 = vmatprep.subr.bf16.mxu1 %v2781_v14  ;;  %v978_v24 = vrot.slane %v976_v43, 4  ;;  %v1013_v23 = vshrl.u32 %v3147_v38, 16  ;;  %v2804_v30 = vld [vmem:[%s3520_s1 + $0x110] sm:$0xff]   ;;  %v1217_v36 = vrot.slane %v3193_v8, 5  ;;  %v3234_v44 = vrot.slane %v1009_v29, 5 }
  0x3d   : > { %v969_v57 = vrot.slane %v968_v39, 4  ;;  %v1216_v39 = vrot.slane %v1214_v19, 4  ;;  %v1005_v43 = vrot.slane %v1003_v21, 5 }
  0x3e   : > { %2554 = vmatpush3.bf16.msra.mxu0 %v2780_v56  ;;  %v959_v56 = vrot.slane %v958_v22, 4  ;;  %v982_v18 = vor.u32 %v981_v9, %v978_v24  ;;  %v2809_v24 = vld [vmem:[%s3520_s1 + $0x140] sm:$0xff]  }
  0x3f   : > { %2578 = vmatpush3.bf16.msra.mxu1 %v2781_v14  ;;  %2555 = vmatprep.subr.bf16.mxu0 %v2784_v62  ;;  %v2254_v14 = vrot.slane %v3075_v55, 9  ;;  %v2217_v55 = vcombine.low %v3164_v50, %v3171_v54  ;;  %v974_v3 = vsel %vm2976_vm2, %v969_v57, %v973_v12  ;;  %v1029_v57 = vrot.slane %v1027_v15, 5  ;;  %v2811_v15 = vld [vmem:[%s3520_s1 + $0x1f8] sm:$0xff]  }
  0x40   : > { %2579 = vmatprep.subr.bf16.mxu1 %v2785_v63  ;;  %v964_v0 = vsel %vm2976_vm2, %v959_v56, %v963_v32  ;;  %v3222_v32 = vrot.slane %v995_v1, 5  ;;  %v3229_v22 = vrot.slane %v982_v18, 4 }
  0x41   : > { %v1208_v6 = vsel %vm3052_vm5, %v2254_v14, %v1207_v41  ;;  %v2242_v20 = vcombine.low %v964_v0, %v974_v3  ;;  %v1002_v41 = vrot.slane %v1000_v2, 4  ;;  %v1228_v2 = vrot.slane %v3171_v54, 5 }
  0x42   : > { %2556 = vmatpush3.bf16.msra.mxu0 %v2784_v62  ;;  %v2177_v62 = vcombine.low %v615_v49, %v618_v52  ;;  %v3245_v52 = vld [vmem:[%s2931_s8 + $0x38] sm:$0x1] }
  0x43   : > { %2580 = vmatpush3.bf16.msra.mxu1 %v2785_v63  ;;  %2557 = vmatprep.subr.bf16.mxu0 %v2786_v5  ;;  %v2797_v63 = vld [vmem:[%s3520_s1 + $0x168] sm:$0xff]   ;;  %v1006_v49 = vor.u32 %v1005_v43, %v1002_v41  ;;  %v1231_v41 = vrot.slane %v3245_v52, 5 }
  0x44   : > { %2581 = vmatprep.subr.bf16.mxu1 %v2787_v7 }
  0x46   : > { %2558 = vmatpush3.bf16.msra.mxu0 %v2786_v5  ;;  %v985_v5 = vshll.u32 %v3129_v27, 16  ;;  %v2803_v27 = vld [vmem:[%s3520_s1 + $0x158] sm:$0xff]  }
  0x47   : > { %2582 = vmatpush3.bf16.msra.mxu1 %v2787_v7  ;;  %2559 = vmatprep.subr.bf16.mxu0 %v2788_v10  ;;  %v1211_v7 = vsel %vm3052_vm5, %v1209_v58, %v1210_v59 }
  0x48   : > { %2583 = vmatprep.subr.bf16.mxu1 %v2789_v11  ;;  %v2274_v16 = vcombine.low %v1208_v6, %v1211_v7  ;;  %v3201_v17 = vrot.slane %v985_v5, 5  ;;  %v1007_v5 = vrot.slane %v1006_v49, 4  ;;  %v2814_v49 = vld [vmem:[%s3520_s1 + $0x1a8] sm:$0xff]  }
  0x4a   : > { %2560 = vmatpush3.bf16.msra.mxu0 %v2788_v10  ;;  %v2801_v10 = vld [vmem:[%s3520_s1 + $0x160] sm:$0xff]   ;;  %v988_v14 = vsel %vm2976_vm2, %v3229_v22, %v3201_v17 }
  0x4b   : > { %2584 = vmatpush3.bf16.msra.mxu1 %v2789_v11  ;;  %2593 = vmatprep.subr.bf16.mxu0 %v2792_v4  ;;  %v991_v11 = vrot.slane %v989_v61, 4  ;;  %v3260_v61 = vld [vmem:[%s2931_s8 + $0x18] sm:$0xf] }
  0x4c   : > { %2617 = vmatprep.subr.bf16.mxu1 %v2793_v28  ;;  %v1566_v0 = vshrl.u32 %v3260_v61, 16  ;;  %v1569_v3 = vshll.u32 %v3260_v61, 16 }
  0x4d   : > { %2562 = vmatmul.mubr.bf16.vlgmr.msra.gmra.mxu0 %v2175_v33  ;;  %v992_v31 = vor.u32 %v991_v11, %v3201_v17  ;;  %v2255_v33 = vrot.slane %v3126_v26, 9  ;;  %v1015_v26 = vrot.slane %v1013_v23, 4  ;;  %v2810_v11 = vld [vmem:[%s3520_s1 + $0x1b8] sm:$0xff]  }
  0x4e   : > { %2586 = vmatmul.mubr.bf16.vlgmr.msra.gmra.mxu1 %v2215_v40  ;;  %2594 = vmatpush3.bf16.msra.mxu0 %v2792_v4  ;;  %v1024_v4 = vshrl.u32 %v3164_v50, 16  ;;  %v3232_v40 = vld [vmem:[%s2931_s8 + $0x2c] sm:$0x1]  ;;  %v1568_v18 = vrot.slane %v1566_v0, 4 }
  0x4f   : > { %2618 = vmatpush3.bf16.msra.mxu1 %v2793_v28  ;;  %2595 = vmatprep.subr.bf16.mxu0 %v2794_v45  ;;  %v1037_v28 = vshrl.u32 %v3171_v54, 16  ;;  %v993_v46 = vrot.slane %v992_v31, 4  ;;  %v1019_v51 = vshll.u32 %v3232_v40, 16  ;;  %v1016_v56 = vor.u32 %v1015_v26, %v3234_v44 }
  0x50   : > { %2619 = vmatprep.subr.bf16.mxu1 %v2795_v47  ;;  %2565 = vmatprep.mubr.bf16.mxu0 %v2176_v48  ;;  %v2807_v48 = vld [vmem:[%s3520_s1 + $0x148] sm:$0xff]   ;;  %v3254_v58 = vsel %vm3052_vm5, %v2255_v33, %v1214_v19  ;;  %v1224_v1 = vrot.slane %v3232_v40, 5  ;;  %v1571_v19 = vrot.slane %v1569_v3, 5  ;;  %v2812_v33 = vld [vmem:[%s3520_s1 + $0x1b0] sm:$0xff]   ;;  %v1230_v40 = vrot.slane %v1228_v2, 4 }
  0x51   : > { %2589 = vmatprep.mubr.bf16.mxu1 %v2216_v53  ;;  %v1026_v53 = vrot.slane %v1024_v4, 4  ;;  %v1039_v12 = vrot.slane %v1037_v28, 4  ;;  %v1021_v6 = vrot.slane %v1019_v51, 5  ;;  %v1017_v9 = vrot.slane %v1016_v56, 4  ;;  %v3292_v4 = vld [vmem:[%s2931_s8 + $0x20] sm:$0x1] }
  0x52   : > { %2596 = vmatpush3.bf16.msra.mxu0 %v2794_v45  ;;  %v2806_v45 = vld [vmem:[%s3520_s1 + $0x108] sm:$0xff]  }
  0x53   : > { %2620 = vmatpush3.bf16.msra.mxu1 %v2795_v47  ;;  %2597 = vmatprep.subr.bf16.mxu0 %v2796_v60  ;;  %v1033_v47 = vshll.u32 %v3171_v54, 16  ;;  %v1012_v54 = vsel %vm2976_vm2, %v1007_v5, %v3234_v44  ;;  %v1022_v29 = vsel %vm2976_vm2, %v1017_v9, %v1021_v6  ;;  %v2819_v9 = vld [vmem:[%s3520_s1 + $0x1d8] sm:$0xff]  }
  0x54   : > { %2621 = vmatprep.subr.bf16.mxu1 %v2797_v63  ;;  %v2244_v43 = vcombine.low %v1012_v54, %v1022_v29 }
  0x55   : > { %2566 = vmatmul.mubr.bf16.gmra.mxu0 %v2177_v62  ;;  %v3256_v59 = vrot.slane %v1033_v47, 5  ;;  %v998_v62 = vsel %vm2976_vm2, %v993_v46, %v3222_v32  ;;  %v2257_v32 = vrot.slane %v3164_v50, 9  ;;  %v2813_v50 = vld [vmem:[%s3520_s1 + $0x1f0] sm:$0xff]  }
  0x56   : > { %2598 = vmatpush3.bf16.msra.mxu0 %v2796_v60  ;;  %2590 = vmatmul.mubr.bf16.gmra.mxu1 %v2217_v55  ;;  %v1221_v60 = vrot.slane %v3147_v38, 5  ;;  %v3268_v55 = vld [vmem:[%s2931_s8 + $0x1c] sm:$0xf]  ;;  %v2808_v38 = vld [vmem:[%s3520_s1 + $0x100] sm:$0xff]  }
  0x57   : > { %2622 = vmatpush3.bf16.msra.mxu1 %v2797_v63  ;;  %2599 = vmatprep.subr.bf16.mxu0 %v2800_v25  ;;  %v1218_v63 = vsel %vm3052_vm5, %v1216_v39, %v1217_v36  ;;  %v1579_v7 = vshrl.u32 %v3268_v55, 16  ;;  %v1575_v8 = vshll.u32 %v3268_v55, 16  ;;  %v1585_v39 = vshll.u32 %v3292_v4, 16 }
  0x58   : > { %2623 = vmatprep.subr.bf16.mxu1 %v2801_v10  ;;  %2609 = vmatprep.mubr.bf16.mxu0 %v2242_v20  ;;  %v2256_v20 = vrot.slane %v3140_v34, 9  ;;  %v1223_v17 = vrot.slane %v1221_v60, 4  ;;  %v2275_v34 = vcombine.low %v3254_v58, %v1218_v63  ;;  %v1229_v51 = vsel %vm3052_vm5, %v2257_v32, %v1228_v2 }
  0x59   : > { %2633 = vmatprep.mubr.bf16.mxu1 %v2274_v16  ;;  %v1040_v16 = vor.u32 %v1039_v12, %v3256_v59  ;;  %v3288_v21 = vrot.slane %v1575_v8, 5  ;;  %v1581_v23 = vrot.slane %v1579_v7, 4  ;;  %v2314_v63 = vcombine.low %v3260_v61, %v3268_v55  ;;  %v2818_v7 = vld [vmem:[%s3520_s1 + $0x198] sm:$0xff]   ;;  %v3358_v8 = vld [vmem:[%s2931_s8 + $0x30] sm:$0xf] }
  0x5a   : > { %2600 = vmatpush3.bf16.msra.mxu0 %v2800_v25  ;;  %v1030_v25 = vor.u32 %v1029_v57, %v1026_v53  ;;  %v1222_v31 = vsel %vm3052_vm5, %v2256_v20, %v1221_v60  ;;  %v1225_v36 = vsel %vm3052_vm5, %v1223_v17, %v1224_v1  ;;  %v2815_v53 = vld [vmem:[%s3520_s1 + $0x1e8] sm:$0xff]   ;;  %v3332_v57 = vld [vmem:[%s2931_s8 + $0x24] sm:$0xf]  ;;  %v1614_v17 = vshrl.u32 %v3358_v8, 16 }
  0x5b   : > { %2624 = vmatpush3.bf16.msra.mxu1 %v2801_v10  ;;  %2601 = vmatprep.subr.bf16.mxu0 %v2802_v13  ;;  %v1043_v10 = vshll.u32 %v3245_v52, 16  ;;  %v1582_v22 = vor.u32 %v1581_v23, %v3288_v21  ;;  %v2276_v26 = vcombine.low %v1222_v31, %v1225_v36  ;;  %v1232_v52 = vsel %vm3052_vm5, %v1230_v40, %v1231_v41  ;;  %v2816_v60 = vld [vmem:[%s3520_s1 + $0x1a0] sm:$0xff]   ;;  %v3382_v23 = vld [vmem:[%s2931_s8 + $0x3c] sm:$0xf] }
  0x5c   : > { %2625 = vmatprep.subr.bf16.mxu1 %v2803_v27  ;;  %v1031_v28 = vrot.slane %v1030_v25, 4  ;;  %v2277_v12 = vcombine.low %v1229_v51, %v1232_v52  ;;  %v1590_v0 = vshrl.u32 %v3332_v57, 16  ;;  %v1617_v1 = vshll.u32 %v3358_v8, 16  ;;  %v2825_v51 = vld [vmem:[%s3520_s1 + $0x1c0] sm:$0xff]  }
  0x5d   : > { %v1583_v47 = vrot.slane %v1582_v22, 4  ;;  %v1638_v32 = vshrl.u32 %v3382_v23, 16  ;;  %v3410_v52 = vld [vmem:[%s2931_s8 + $0x44] sm:$0x1] }
  0x5e   : > { %2602 = vmatpush3.bf16.msra.mxu0 %v2802_v13  ;;  %v2243_v13 = vcombine.low %v988_v14, %v998_v62  ;;  %v1036_v44 = vsel %vm2976_vm2, %v1031_v28, %v3256_v59  ;;  %v3340_v59 = vld [vmem:[%s2931_s8 + $0x28] sm:$0xf]  ;;  %v2817_v62 = vld [vmem:[%s3520_s1 + $0x1e0] sm:$0xff]   ;;  %v1592_v25 = vrot.slane %v1590_v0, 4  ;;  %v1619_v29 = vrot.slane %v1617_v1, 5 }
  0x5f   : > { %2626 = vmatpush3.bf16.msra.mxu1 %v2803_v27  ;;  %2603 = vmatprep.subr.bf16.mxu0 %v2804_v30  ;;  %v1045_v27 = vrot.slane %v1043_v10, 5  ;;  %v1603_v5 = vshrl.u32 %v3340_v59, 16  ;;  %v1599_v6 = vshll.u32 %v3340_v59, 16  ;;  %v2822_v28 = vld [vmem:[%s3520_s1 + $0x188] sm:$0xff]   ;;  %v1657_v0 = vshll.u32 %v3410_v52, 16 }
  0x60   : > { %2627 = vmatprep.subr.bf16.mxu1 %v2805_v37  ;;  %v2354_v1 = vrot.slane %v3260_v61, 9 }
  0x61   : > { %v3366_v20 = vrot.slane %v1599_v6, 5 }
  0x62   : > { %2604 = vmatpush3.bf16.msra.mxu0 %v2804_v30  ;;  %v1041_v30 = vrot.slane %v1040_v16, 4  ;;  %v3369_v16 = vld [vmem:[%s2931_s8 + $0x2c] sm:$0x1] }
  0x63   : > { %2628 = vmatpush3.bf16.msra.mxu1 %v2805_v37  ;;  %2605 = vmatprep.subr.bf16.mxu0 %v2806_v45  ;;  %v1572_v37 = vor.u32 %v1571_v19, %v1568_v18  ;;  %v2820_v19 = vld [vmem:[%s3520_s1 + $0x190] sm:$0xff]   ;;  %v1609_v54 = vshll.u32 %v3369_v16, 16 }
  0x64   : > { %2629 = vmatprep.subr.bf16.mxu1 %v2807_v48 }
  0x65   : > { %v1573_v46 = vrot.slane %v1572_v37, 4  ;;  %v3396_v37 = vld [vmem:[%s2931_s8 + $0x38] sm:$0x1]  ;;  %v1611_v41 = vrot.slane %v1609_v54, 5 }
  0x66   : > { %2606 = vmatpush3.bf16.msra.mxu0 %v2806_v45  ;;  %v1046_v45 = vsel %vm2976_vm2, %v1041_v30, %v1045_v27  ;;  %v1616_v27 = vrot.slane %v1614_v17, 4 }
  0x67   : > { %2630 = vmatpush3.bf16.msra.mxu1 %v2807_v48  ;;  %2607 = vmatprep.subr.bf16.mxu0 %v2808_v38  ;;  %v1587_v48 = vrot.slane %v1585_v39, 5  ;;  %v2245_v56 = vcombine.low %v1036_v44, %v1046_v45  ;;  %v1578_v14 = vsel %vm2976_vm2, %v1573_v46, %v3288_v21  ;;  %v2821_v21 = vld [vmem:[%s3520_s1 + $0x1d0] sm:$0xff]   ;;  %v2823_v39 = vld [vmem:[%s3520_s1 + $0x1c8] sm:$0xff]   ;;  %v2824_v45 = vld [vmem:[%s3520_s1 + $0x180] sm:$0xff]   ;;  %v1640_v46 = vrot.slane %v1638_v32, 4 }
  0x68   : > { %2631 = vmatprep.subr.bf16.mxu1 %v2809_v24  ;;  %v2834_v32 = vld [vmem:[%s3520_s1 + $0x218] sm:$0xff]  }
  0x69   : > { %v1588_v58 = vsel %vm2976_vm2, %v1583_v47, %v1587_v48 }
  0x6a   : > { %2608 = vmatpush3.bf16.msra.mxu0 %v2808_v38  ;;  %v2342_v3 = vcombine.low %v1578_v14, %v1588_v58  ;;  %v1593_v38 = vshll.u32 %v3332_v57, 16 }
  0x6b   : > { %2632 = vmatpush3.bf16.msra.mxu1 %v2809_v24  ;;  %2641 = vmatprep.subr.bf16.mxu0 %v2810_v11  ;;  %v3361_v24 = vld [vmem:[%s2931_s8 + $0x34] sm:$0xf] }
  0x6c   : > { %2665 = vmatprep.subr.bf16.mxu1 %v2811_v15  ;;  %v1595_v10 = vrot.slane %v1593_v38, 5  ;;  %v1627_v2 = vshrl.u32 %v3361_v24, 16  ;;  %v1623_v18 = vshll.u32 %v3361_v24, 16  ;;  %v1821_v38 = vrot.slane %v3268_v55, 5 }
  0x6d   : > { %2610 = vmatmul.mubr.bf16.vlgmr.msra.gmra.mxu0 %v2243_v13  ;;  %v2316_v55 = vcombine.low %v3358_v8, %v3361_v24 }
  0x6e   : > { %2634 = vmatmul.mubr.bf16.vlgmr.msra.gmra.mxu1 %v2275_v34  ;;  %2642 = vmatpush3.bf16.msra.mxu0 %v2810_v11  ;;  %v1605_v11 = vrot.slane %v1603_v5, 4  ;;  %v3385_v34 = vld [vmem:[%s2931_s8 + $0x40] sm:$0xf]  ;;  %v1596_v13 = vor.u32 %v1595_v10, %v1592_v25  ;;  %v1625_v30 = vrot.slane %v1623_v18, 5  ;;  %v1629_v31 = vrot.slane %v1627_v2, 4  ;;  %v2829_v25 = vld [vmem:[%s3520_s1 + $0x230] sm:$0xff]  }
  0x6f   : > { %2666 = vmatpush3.bf16.msra.mxu1 %v2811_v15  ;;  %2643 = vmatprep.subr.bf16.mxu0 %v2812_v33  ;;  %v1651_v36 = vshrl.u32 %v3385_v34, 16  ;;  %v1647_v22 = vshll.u32 %v3385_v34, 16  ;;  %v1823_v2 = vrot.slane %v1821_v38, 4  ;;  %v1824_v18 = vrot.slane %v3292_v4, 5 }
  0x70   : > { %2667 = vmatprep.subr.bf16.mxu1 %v2813_v50  ;;  %2613 = vmatprep.mubr.bf16.mxu0 %v2244_v43  ;;  %v1606_v15 = vor.u32 %v1605_v11, %v3366_v20  ;;  %v1597_v40 = vrot.slane %v1596_v13, 4  ;;  %v1620_v43 = vor.u32 %v1619_v29, %v1616_v27  ;;  %v1630_v44 = vor.u32 %v1629_v31, %v1625_v30  ;;  %v2833_v29 = vld [vmem:[%s3520_s1 + $0x220] sm:$0xff]  }
  0x71   : > { %2637 = vmatprep.mubr.bf16.mxu1 %v2276_v26  ;;  %v1633_v26 = vshll.u32 %v3396_v37, 16  ;;  %v1649_v48 = vrot.slane %v1647_v22, 5  ;;  %v1659_v11 = vrot.slane %v1657_v0, 5  ;;  %v1838_v13 = vrot.slane %v3396_v37, 5  ;;  %v2836_v22 = vld [vmem:[%s3520_s1 + $0x208] sm:$0xff]  }
  0x72   : > { %2644 = vmatpush3.bf16.msra.mxu0 %v2812_v33  ;;  %v1641_v33 = vshll.u32 %v3382_v23, 16  ;;  %v2317_v4 = vcombine.low %v3382_v23, %v3385_v34  ;;  %v1825_v54 = vsel %vm3052_vm5, %v1823_v2, %v1824_v18  ;;  %v1842_v37 = vrot.slane %v3385_v34, 5  ;;  %v2837_v34 = vld [vmem:[%s3520_s1 + $0x200] sm:$0xff]  }
  0x73   : > { %2668 = vmatpush3.bf16.msra.mxu1 %v2813_v50  ;;  %2645 = vmatprep.subr.bf16.mxu0 %v2814_v49  ;;  %v1607_v50 = vrot.slane %v1606_v15, 4  ;;  %v1635_v14 = vrot.slane %v1633_v26, 5 }
  0x74   : > { %2669 = vmatprep.subr.bf16.mxu1 %v2815_v53  ;;  %v1643_v47 = vrot.slane %v1641_v33, 5  ;;  %v2835_v33 = vld [vmem:[%s3520_s1 + $0x210] sm:$0xff]  }
  0x75   : > { %2614 = vmatmul.mubr.bf16.gmra.mxu0 %v2245_v56  ;;  %v1621_v56 = vrot.slane %v1620_v43, 4  ;;  %v1612_v58 = vsel %vm2976_vm2, %v1607_v50, %v1611_v41  ;;  %v1831_v41 = vrot.slane %v3369_v16, 5  ;;  %v2357_v50 = vrot.slane %v3382_v23, 9 }
  0x76   : > { %2646 = vmatpush3.bf16.msra.mxu0 %v2814_v49  ;;  %2638 = vmatmul.mubr.bf16.gmra.mxu1 %v2277_v12  ;;  %v1653_v49 = vrot.slane %v1651_v36, 4  ;;  %v1631_v12 = vrot.slane %v1630_v44, 4  ;;  %v1828_v36 = vrot.slane %v3340_v59, 5  ;;  %v1844_v43 = vrot.slane %v1842_v37, 4 }
  0x77   : > { %2670 = vmatpush3.bf16.msra.mxu1 %v2815_v53  ;;  %2647 = vmatprep.subr.bf16.mxu0 %v2816_v60  ;;  %v1602_v53 = vsel %vm2976_vm2, %v1597_v40, %v3366_v20  ;;  %v1626_v6 = vsel %vm2976_vm2, %v1621_v56, %v1625_v30  ;;  %v1843_v16 = vsel %vm3052_vm5, %v2357_v50, %v1842_v37 }
  0x78   : > { %2671 = vmatprep.subr.bf16.mxu1 %v2817_v62  ;;  %2657 = vmatprep.mubr.bf16.mxu0 %v2314_v63  ;;  %v1654_v63 = vor.u32 %v1653_v49, %v1649_v48  ;;  %v2343_v5 = vcombine.low %v1602_v53, %v1612_v58  ;;  %v1830_v40 = vrot.slane %v1828_v36, 4 }
  0x79   : > { %2681 = vmatprep.mubr.bf16.mxu1 %v2342_v3  ;;  %v2315_v3 = vcombine.low %v3332_v57, %v3340_v59  ;;  %v1845_v59 = vrot.slane %v3410_v52, 5 }
  0x7a   : > { %2648 = vmatpush3.bf16.msra.mxu0 %v2816_v60  ;;  %v2828_v60 = vld [vmem:[%s3520_s1 + $0x238] sm:$0xff]   ;;  %v1655_v20 = vrot.slane %v1654_v63, 4 }
  0x7b   : > { %2672 = vmatpush3.bf16.msra.mxu1 %v2817_v62  ;;  %2649 = vmatprep.subr.bf16.mxu0 %v2818_v7  ;;  %v1644_v62 = vor.u32 %v1643_v47, %v1640_v46  ;;  %v1846_v23 = vsel %vm3052_vm5, %v1844_v43, %v1845_v59 }
  0x7c   : > { %2673 = vmatprep.subr.bf16.mxu1 %v2819_v9  ;;  %v1660_v61 = vsel %vm2976_vm2, %v1655_v20, %v1659_v11 }
  0x7d   : > { %v1645_v10 = vrot.slane %v1644_v62, 4 }
  0x7e   : > { %2650 = vmatpush3.bf16.msra.mxu0 %v2818_v7  ;;  %v1636_v7 = vsel %vm2976_vm2, %v1631_v12, %v1635_v14 }
  0x7f   : > { %2674 = vmatpush3.bf16.msra.mxu1 %v2819_v9  ;;  %2651 = vmatprep.subr.bf16.mxu0 %v2820_v19  ;;  %v1835_v9 = vrot.slane %v3361_v24, 5  ;;  %v2344_v17 = vcombine.low %v1626_v6, %v1636_v7  ;;  %v2832_v24 = vld [vmem:[%s3520_s1 + $0x228] sm:$0xff]   ;;  %v1650_v15 = vsel %vm2976_vm2, %v1645_v10, %v1649_v48 }
  0x80   : > { %2675 = vmatprep.subr.bf16.mxu1 %v2821_v21 }
  0x82   : > { %2652 = vmatpush3.bf16.msra.mxu0 %v2820_v19  ;;  %v2356_v19 = vrot.slane %v3358_v8, 9  ;;  %v1822_v8 = vsel %vm3052_vm5, %v2354_v1, %v1821_v38 }
  0x83   : > { %2676 = vmatpush3.bf16.msra.mxu1 %v2821_v21  ;;  %2653 = vmatprep.subr.bf16.mxu0 %v2822_v28  ;;  %v1837_v21 = vrot.slane %v1835_v9, 4  ;;  %v2374_v30 = vcombine.low %v1822_v8, %v1825_v54 }
  0x84   : > { %2677 = vmatprep.subr.bf16.mxu1 %v2823_v39  ;;  %v1836_v27 = vsel %vm3052_vm5, %v2356_v19, %v1835_v9 }
  0x85   : > { %v1839_v35 = vsel %vm3052_vm5, %v1837_v21, %v1838_v13 }
  0x86   : > { %2654 = vmatpush3.bf16.msra.mxu0 %v2822_v28  ;;  %v2345_v28 = vcombine.low %v1650_v15, %v1660_v61  ;;  %v2376_v31 = vcombine.low %v1836_v27, %v1839_v35 }
  0x87   : > { %2678 = vmatpush3.bf16.msra.mxu1 %v2823_v39  ;;  %2655 = vmatprep.subr.bf16.mxu0 %v2824_v45  ;;  %v2355_v39 = vrot.slane %v3332_v57, 9  ;;  %v1832_v57 = vsel %vm3052_vm5, %v1830_v40, %v1831_v41 }
  0x88   : > { %2679 = vmatprep.subr.bf16.mxu1 %v2825_v51 }
  0x89   : > { %v1829_v44 = vsel %vm3052_vm5, %v2355_v39, %v1828_v36 }
  0x8a   : > { %2656 = vmatpush3.bf16.msra.mxu0 %v2824_v45  ;;  %v2375_v26 = vcombine.low %v1829_v44, %v1832_v57  ;;  %v2377_v45 = vcombine.low %v1843_v16, %v1846_v23 }
  0x8b   : > { %2680 = vmatpush3.bf16.msra.mxu1 %v2825_v51  ;;  %2689 = vmatprep.subr.bf16.mxu0 %v2828_v60 }
  0x8c   : > { %2713 = vmatprep.subr.bf16.mxu1 %v2828_v60 }
  0x8d   : > { %2658 = vmatmul.mubr.bf16.vlgmr.msra.gmra.mxu0 %v2315_v3 }
  0x8e   : > { %2682 = vmatmul.mubr.bf16.vlgmr.msra.gmra.mxu1 %v2343_v5  ;;  %2690 = vmatpush3.bf16.msra.mxu0 %v2828_v60 }
  0x8f   : > { %2721 = vmatpush3.bf16.msra.mxu1 %v2828_v60  ;;  %2691 = vmatprep.subr.bf16.mxu0 %v2829_v25 }
  0x90   : > { %2714 = vmatprep.subr.bf16.mxu1 %v2829_v25  ;;  %2661 = vmatprep.mubr.bf16.mxu0 %v2316_v55 }
  0x91   : > { %2685 = vmatprep.mubr.bf16.mxu1 %v2344_v17 }
  0x92   : > { %2692 = vmatpush3.bf16.msra.mxu0 %v2829_v25 }
  0x93   : > { %2722 = vmatpush3.bf16.msra.mxu1 %v2829_v25  ;;  %2693 = vmatprep.subr.bf16.mxu0 %v2832_v24 }
  0x94   : > { %2715 = vmatprep.subr.bf16.mxu1 %v2832_v24 }
  0x95   : > { %2662 = vmatmul.mubr.bf16.gmra.mxu0 %v2317_v4 }
  0x96   : > { %2694 = vmatpush3.bf16.msra.mxu0 %v2832_v24  ;;  %2686 = vmatmul.mubr.bf16.gmra.mxu1 %v2345_v28 }
  0x97   : > { %2723 = vmatpush3.bf16.msra.mxu1 %v2832_v24  ;;  %2695 = vmatprep.subr.bf16.mxu0 %v2833_v29 }
  0x98   : > { %2716 = vmatprep.subr.bf16.mxu1 %v2833_v29  ;;  %2705 = vmatprep.mubr.bf16.mxu0 %v2374_v30 }
  0x99   : > { %2709 = vmatprep.mubr.bf16.mxu1 %v2376_v31 }
  0x9a   : > { %2696 = vmatpush3.bf16.msra.mxu0 %v2833_v29 }
  0x9b   : > { %2724 = vmatpush3.bf16.msra.mxu1 %v2833_v29  ;;  %2697 = vmatprep.subr.bf16.mxu0 %v2834_v32 }
  0x9c   : > { %2717 = vmatprep.subr.bf16.mxu1 %v2834_v32 }
  0x9e   : > { %2698 = vmatpush3.bf16.msra.mxu0 %v2834_v32 }
  0x9f   : > { %2725 = vmatpush3.bf16.msra.mxu1 %v2834_v32  ;;  %2699 = vmatprep.subr.bf16.mxu0 %v2835_v33 }
  0xa0   : > { %2718 = vmatprep.subr.bf16.mxu1 %v2835_v33 }
  0xa2   : > { %2700 = vmatpush3.bf16.msra.mxu0 %v2835_v33 }
  0xa3   : > { %2726 = vmatpush3.bf16.msra.mxu1 %v2835_v33  ;;  %2701 = vmatprep.subr.bf16.mxu0 %v2836_v22 }
  0xa4   : > { %2719 = vmatprep.subr.bf16.mxu1 %v2836_v22 }
  0xa6   : > { %2702 = vmatpush3.bf16.msra.mxu0 %v2836_v22 }
  0xa7   : > { %2727 = vmatpush3.bf16.msra.mxu1 %v2836_v22  ;;  %2703 = vmatprep.subr.bf16.mxu0 %v2837_v34 }
  0xa8   : > { %2720 = vmatprep.subr.bf16.mxu1 %v2837_v34 }
  0xaa   : > { %2704 = vmatpush3.bf16.msra.mxu0 %v2837_v34 }
  0xab   : > { %2728 = vmatpush3.bf16.msra.mxu1 %v2837_v34 }
  0xad   : > { %2706 = vmatmul.mubr.bf16.vlgmr.msra.gmra.mxu0 %v2375_v26 }
  0xae   : > { %2710 = vmatmul.mubr.bf16.vlgmr.msra.gmra.mxu1 %v2377_v45 }
  0xed   : > { %v2515_v46 = vpop.f32.mrf.mxu0 }
  0xee   : > { %v2539_v48 = vpop.f32.mrf.mxu1 }
  0xef   : > { %v416_v47 = vpop.f32.mrf.mxu0  ;;  %v562_v41 = vadd.f32 %v2539_v48, %v2515_v46 }
  0xf0   : > { %v553_v51 = vpop.f32.mrf.mxu1 }
  0xf1   : > { %v2516_v49 = vpop.f32.mrf.mxu0  ;;  %v554_v34 = vadd.f32 %v553_v51, %v416_v47 }
  0xf2   : > { %v2540_v56 = vpop.f32.mrf.mxu1 }
  0xf3   : > { %v419_v52 = vpop.f32.mrf.mxu0  ;;  %v565_v23 = vadd.f32 %v2540_v56, %v2516_v49 }
  0xf4   : > { %v556_v14 = vpop.f32.mrf.mxu1 }
  0xf5   : > { %v2519_v53 = vpop.f32.mrf.mxu0  ;;  %v557_v48 = vadd.f32 %v556_v14, %v419_v52 }
  0xf6   : > { %v2543_v58 = vpop.f32.mrf.mxu1 }
  0xf7   : > { %v432_v12 = vpop.f32.mrf.mxu0  ;;  %v578_v43 = vadd.f32 %v2543_v58, %v2519_v53 }
  0xf8   : > { %v569_v60 = vpop.f32.mrf.mxu1 }
  0xf9   : > { %v2520_v42 = vpop.f32.mrf.mxu0  ;;  %v570_v57 = vadd.f32 %v569_v60, %v432_v12 }
  0xfa   : > { %v2544_v0 = vpop.f32.mrf.mxu1 }
  0xfb   : > { %v435_v62 = vpop.f32.mrf.mxu0 }
  0xfc   : > { %v572_v38 = vpop.f32.mrf.mxu1 }
  0xfd   : > { %v573_v47 = vadd.f32 %v572_v38, %v435_v62 }
 0x10d   : > { %v2563_v63 = vpop.f32.mrf.mxu0 }
 0x10e   : > { %v2587_v5 = vpop.f32.mrf.mxu1  ;;  %v767_v44 = vadd.f32 %v2563_v63, %v562_v41 }
 0x10f   : > { %v734_v3 = vpop.f32.mrf.mxu0 }
 0x110   : > { %v912_v7 = vpop.f32.mrf.mxu1  ;;  %v765_v26 = vadd.f32 %v734_v3, %v554_v34 }
 0x111   : > { %v2564_v6 = vpop.f32.mrf.mxu0 }
 0x112   : > { %v2588_v25 = vpop.f32.mrf.mxu1  ;;  %v768_v53 = vadd.f32 %v2564_v6, %v565_v23  ;;  %v943_v63 = vadd.f32 %v912_v7, %v765_v26 }
 0x113   : > { %v737_v9 = vpop.f32.mrf.mxu0 }
 0x114   : > { %v915_v20 = vpop.f32.mrf.mxu1  ;;  %v766_v12 = vadd.f32 %v737_v9, %v557_v48  ;;  %v946_v3 = vadd.f32 %v2588_v25, %v768_v53 }
 0x115   : > { %v2567_v10 = vpop.f32.mrf.mxu0 }
 0x116   : > { %v2591_v55 = vpop.f32.mrf.mxu1  ;;  %v771_v16 = vadd.f32 %v2567_v10, %v578_v43 }
 0x117   : > { %v750_v11 = vpop.f32.mrf.mxu0 }
 0x118   : > { %v928_v1 = vpop.f32.mrf.mxu1  ;;  %v949_v51 = vadd.f32 %v2591_v55, %v771_v16 }
 0x119   : > { %v2568_v17 = vpop.f32.mrf.mxu0 }
 0x11a   : > { %v2592_v18 = vpop.f32.mrf.mxu1 }
 0x11b   : > { %v753_v2 = vpop.f32.mrf.mxu0 }
 0x11c   : > { %v931_v21 = vpop.f32.mrf.mxu1  ;;  %v770_v43 = vadd.f32 %v753_v2, %v573_v47 }
 0x12d   : > { %v2611_v19 = vpop.f32.mrf.mxu0 }
 0x12e   : > { %v2635_v24 = vpop.f32.mrf.mxu1 }
 0x12f   : > { %v1162_v13 = vpop.f32.mrf.mxu0 }
 0x130   : > { %v1348_v61 = vpop.f32.mrf.mxu1  ;;  %v1193_v34 = vadd.f32 %v1162_v13, %v943_v63 }
 0x131   : > { %v2612_v15 = vpop.f32.mrf.mxu0 }
 0x132   : > { %v2636_v8 = vpop.f32.mrf.mxu1  ;;  %v1196_v14 = vadd.f32 %v2612_v15, %v946_v3  ;;  %v1379_v7 = vadd.f32 %v1348_v61, %v1193_v34 }
 0x133   : > { %v1165_v4 = vpop.f32.mrf.mxu0 }
 0x134   : > { %v3484_v28 = vpop.f32.mrf.mxu1  ;;  %v1382_v25 = vadd.f32 %v2636_v8, %v1196_v14 }
 0x135   : > { %v2615_v54 = vpop.f32.mrf.mxu0  ;;  %3526 = vst [vmem:[#allocation2_spill] sm:$0xff] %v3484_v28  ;;  %v581_v28 = vadd.f32 %v2544_v0, %v2520_v42 }
 0x136   : > { %v2639_v27 = vpop.f32.mrf.mxu1  ;;  %v1199_v49 = vadd.f32 %v2615_v54, %v949_v51 }
 0x137   : > { %v1178_v35 = vpop.f32.mrf.mxu0  ;;  %v772_v41 = vadd.f32 %v2568_v17, %v581_v28 }
 0x138   : > { %v1364_v29 = vpop.f32.mrf.mxu1  ;;  %v1385_v62 = vadd.f32 %v2639_v27, %v1199_v49 }
 0x139   : > { %v2616_v30 = vpop.f32.mrf.mxu0  ;;  %v950_v42 = vadd.f32 %v2592_v18, %v772_v41 }
 0x13a   : > { %v2640_v31 = vpop.f32.mrf.mxu1 }
 0x13b   : > { %v1181_v32 = vpop.f32.mrf.mxu0  ;;  %v1200_v38 = vadd.f32 %v2616_v30, %v950_v42 }
 0x13c   : > { %v1367_v36 = vpop.f32.mrf.mxu1  ;;  %v3530_v28 = vld [vmem:[#allocation2_spill] sm:$0xff] }
 0x13d   : > { %v1386_v18 = vadd.f32 %v2640_v31, %v1200_v38 }
 0x14d   : > { %v2659_v33 = vpop.f32.mrf.mxu0 }
 0x14e   : > { %v2683_v37 = vpop.f32.mrf.mxu1 }
 0x14f   : > { %v1526_v22 = vpop.f32.mrf.mxu0 }
 0x150   : > { %v3486_v39 = vpop.f32.mrf.mxu1  ;;  %v1557_v13 = vadd.f32 %v1526_v22, %v1379_v7 }
 0x151   : > { %3527 = vst [vmem:[#allocation3_spill] sm:$0xff] %v3486_v39  ;;  %v2660_v40 = vpop.f32.mrf.mxu0  ;;  %v769_v39 = vadd.f32 %v750_v11, %v570_v57  ;;  %v944_v11 = vadd.f32 %v915_v20, %v766_v12 }
 0x152   : > { %v3488_v50 = vpop.f32.mrf.mxu1 }
 0x153   : > { %3528 = vst [vmem:[#allocation4_spill] sm:$0xff] %v3488_v50  ;;  %v1529_v59 = vpop.f32.mrf.mxu0  ;;  %v945_v50 = vadd.f32 %v2587_v5, %v767_v44  ;;  %v947_v10 = vadd.f32 %v928_v1, %v769_v39  ;;  %v948_v5 = vadd.f32 %v931_v21, %v770_v43  ;;  %v1194_v9 = vadd.f32 %v1165_v4, %v944_v11 }
 0x154   : > { %v3490_v45 = vpop.f32.mrf.mxu1  ;;  %v1560_v21 = vadd.f32 %v2660_v40, %v1382_v25 }
 0x155   : > { %3529 = vst [vmem:[#allocation5_spill] sm:$0xff] %v3490_v45  ;;  %v2663_v46 = vpop.f32.mrf.mxu0  ;;  %v1195_v60 = vadd.f32 %v2611_v19, %v945_v50  ;;  %v1197_v0 = vadd.f32 %v1178_v35, %v947_v10  ;;  %v1198_v2 = vadd.f32 %v1181_v32, %v948_v5 }
 0x156   : > { %v2687_v58 = vpop.f32.mrf.mxu1  ;;  %v1563_v19 = vadd.f32 %v2663_v46, %v1385_v62 }
 0x157   : > { %v1542_v56 = vpop.f32.mrf.mxu0  ;;  %v1381_v52 = vadd.f32 %v2635_v24, %v1195_v60  ;;  %v1383_v1 = vadd.f32 %v1364_v29, %v1197_v0  ;;  %v1380_v24 = vadd.f32 %v3530_v28, %v1194_v9  ;;  %v1384_v35 = vadd.f32 %v1367_v36, %v1198_v2 }
 0x158   : > { %v1792_v45 = vpop.f32.mrf.mxu1  ;;  %v1813_v30 = vadd.f32 %v2687_v58, %v1563_v19  ;;  %v3531_v8 = vld [vmem:[#allocation3_spill] sm:$0xff] }
 0x159   : > { %v2664_v6 = vpop.f32.mrf.mxu0  ;;  %v1559_v55 = vadd.f32 %v2659_v33, %v1381_v52  ;;  %v1561_v54 = vadd.f32 %v1542_v56, %v1383_v1  ;;  %v1807_v29 = vadd.f32 %v3531_v8, %v1557_v13  ;;  %v1558_v31 = vadd.f32 %v1529_v59, %v1380_v24 }
 0x15a   : > { %v2688_v17 = vpop.f32.mrf.mxu1  ;;  %v1564_v61 = vadd.f32 %v2664_v6, %v1386_v18  ;;  %v3532_v40 = vld [vmem:[#allocation4_spill] sm:$0xff] }
 0x15b   : > { %v1545_v20 = vpop.f32.mrf.mxu0  ;;  %v1809_v15 = vadd.f32 %v2683_v37, %v1559_v55  ;;  %v1811_v37 = vadd.f32 %v1792_v45, %v1561_v54  ;;  %v1810_v50 = vadd.f32 %v3532_v40, %v1560_v21 }
 0x15c   : > { %v1795_v27 = vpop.f32.mrf.mxu1  ;;  %v1562_v22 = vadd.f32 %v1545_v20, %v1384_v35  ;;  %v1814_v16 = vadd.f32 %v2688_v17, %v1564_v61  ;;  %v3533_v26 = vld [vmem:[#allocation5_spill] sm:$0xff] }
 0x15d   : > { %v1808_v46 = vadd.f32 %v3533_v26, %v1558_v31 }
 0x15e   : > { %v1812_v53 = vadd.f32 %v1795_v27, %v1562_v22 }
 0x16d   : > { %v2707_v4 = vpop.f32.mrf.mxu0 }
 0x16e   : > { %v1995_v32 = vadd.f32 %v2707_v4, %v1809_v15  ;;  %v2711_v33 = vpop.f32.mrf.mxu1 }
 0x16f   : > { %v1999_v36 = vadd.f32 %v2711_v33, %v1813_v30  ;;  %v1962_v39 = vpop.f32.mrf.mxu0 }
 0x170   : > { %2003 = vst [vmem:[%s3497_s24 + $0x10] sm:$0xff] %v1995_v32  ;;  %v1993_v44 = vadd.f32 %v1962_v39, %v1807_v29  ;;  %v1978_v57 = vpop.f32.mrf.mxu1 }
 0x171   : > { %2007 = vst [vmem:[%s3497_s24 + $0x30] sm:$0xff] %v1999_v36  ;;  %v1997_v23 = vadd.f32 %v1978_v57, %v1811_v37  ;;  %v2708_v59 = vpop.f32.mrf.mxu0 }
 0x172   : > { %2001 = vst [vmem:[%s3497_s24] sm:$0xff] %v1993_v44  ;;  %v1996_v45 = vadd.f32 %v2708_v59, %v1810_v50  ;;  %v2712_v48 = vpop.f32.mrf.mxu1 }
 0x173   : > { %2005 = vst [vmem:[%s3497_s24 + $0x20] sm:$0xff] %v1997_v23  ;;  %v2000_v58 = vadd.f32 %v2712_v48, %v1814_v16  ;;  %v1965_v47 = vpop.f32.mrf.mxu0 }
 0x174   : > { %2004 = vst [vmem:[%s3497_s24 + $0x18] sm:$0xff] %v1996_v45  ;;  %v1994_v51 = vadd.f32 %v1965_v47, %v1808_v46  ;;  %v1981_v41 = vpop.f32.mrf.mxu1 }
 0x175   : > { %2008 = vst [vmem:[%s3497_s24 + $0x38] sm:$0xff] %v2000_v58  ;;  %v1998_v63 = vadd.f32 %v1981_v41, %v1812_v53 }
 0x176   : > { %2002 = vst [vmem:[%s3497_s24 + $0x8] sm:$0xff] %v1994_v51 }
 0x177   : > { %2006 = vst [vmem:[%s3497_s24 + $0x28] sm:$0xff] %v1998_v63 }
 0x178 PF: > { %s12_s11 = sadd.s32 1, %s2860_s11   ;;  %s3534_s9 = smov %s2856_s10 }
 0x179   : > { %p9_p5 = scmp.ge.s32.totalorder %s12_s11, 4   ;;  %s3535_s10 = smov %s3537_s12 }
 0x17b   :  { %11 = sbr.rel (!%p9_p5) target bundleno = 2 (0x2), region = 69 }

</bundles_post_ra>
